<compile_context>
chip_gen: v6e
topology: v6e:2x2x1
jax: 0.10.0
libtpu: 0.0.40
codegen_flags: <defaults>
</compile_context>

<pallas_src>
import functools

import jax
import jax.numpy as jnp
from jax.experimental import pallas as pl
from jax.experimental.pallas import tpu as pltpu


def _cdiv(a: int, b: int) -> int:
    return -(-a // b)


def _round_up(a: int, b: int) -> int:
    return _cdiv(a, b) * b


def _tpu_vmem_capacity_bytes() -> int:
    try:
        info = pltpu.get_tpu_info()
        cap = getattr(info, "vmem_capacity_bytes", None)
        if cap:
            return int(cap)
    except Exception:
        pass
    return 64 * 1024 * 1024  # conservative (v7x per-TC VMEM)


def _tpu_num_tensorcores() -> int:
    try:
        info = pltpu.get_tpu_info()
        for name in ("num_cores", "cores_per_chip", "tensorcores_per_chip",
                     "num_tensorcores"):
            v = getattr(info, name, None)
            if v:
                return int(v)
    except Exception:
        pass
    return 1


def _graph_pool_kernel(n_ref, h_ref, o_ref, acc_ref, *, tn, num_tiles):
    # n_ref:   (1,) int32 SMEM scalar-prefetch -- true number of rows N.
    # h_ref:   (tn, D)  input tile (any float dtype).
    # o_ref:   (1, 1, D) per-split partial sum (float32), resident across the
    #          reduction ("arbitrary") grid axis.
    # acc_ref: (8, D)   float32 VMEM accumulator (per-sublane partial sums).
    p = pl.program_id(0)
    i = pl.program_id(1)
    d = h_ref.shape[1]

    @pl.when(i == 0)
    def _init():
        acc_ref[...] = jnp.zeros_like(acc_ref)

    tile = h_ref[...].astype(jnp.float32)          # (tn, D)
    gb = p * num_tiles + i                         # global block index
    n = n_ref[0]
    overhangs = (gb + 1) * tn > n                  # tile may extend past row N

    @pl.when(jnp.logical_not(overhangs))
    def _acc_full():
        # Pure VPU adds; cross-sublane reduce is deferred to finalize.
        acc_ref[...] += jnp.sum(tile.reshape(tn // 8, 8, d), axis=0)

    @pl.when(overhangs)
    def _acc_masked():
        # Out-of-bounds rows hold undefined bytes: select (not multiply) so
        # garbage/NaN cannot propagate into the sum.
        rows = jax.lax.broadcasted_iota(jnp.int32, (tn, d), 0) + gb * tn
        masked = jnp.where(rows < n, tile, 0.0)
        acc_ref[...] += jnp.sum(masked.reshape(tn // 8, 8, d), axis=0)

    @pl.when(i == pl.num_programs(1) - 1)
    def _finalize():
        o_ref[0] = jnp.sum(acc_ref[...], axis=0, keepdims=True).astype(o_ref.dtype)


def graph_pooling(
    H: jax.Array,
    *,
    num_splits: int | None = None,
    tile_bytes: int | None = None,
    vmem_limit_bytes: int | None = None,
) -> jax.Array:
    """Sum over axis 0 of a 2-D array H (== torch GraphPooling.forward)."""
    N, D = H.shape
    in_dtype = H.dtype
    itemsize = jnp.dtype(in_dtype).itemsize

    # Parallel node split: one partial per TensorCore (P=1 on v5e/v6e).
    P = int(num_splits) if num_splits is not None else _tpu_num_tensorcores()
    P = max(1, min(P, _cdiv(N, 8)))

    # Per-generation VMEM sizing: 64 MiB scoped limit on 128-MiB chips,
    # 32 MiB on v7x's 64-MiB VMEM; each (double-buffered) tile gets ~1/3.
    if vmem_limit_bytes is None:
        vmem_limit_bytes = min(_tpu_vmem_capacity_bytes() // 2, 64 * 1024 * 1024)
    if tile_bytes is None:
        tile_bytes = vmem_limit_bytes // 3

    rows_per_split = _cdiv(N, P)
    tn = max(8, (tile_bytes // (D * itemsize)) // 8 * 8)   # lane-dense, 8-row aligned
    tn = min(tn, _round_up(rows_per_split, 8))
    num_tiles = _cdiv(rows_per_split, tn)

    cost = pl.CostEstimate(
        flops=N * D,
        transcendentals=0,
        bytes_accessed=N * D * itemsize + P * D * 4,
    )

    kernel = functools.partial(_graph_pool_kernel, tn=tn, num_tiles=num_tiles)

    partials = pl.pallas_call(
        kernel,
        out_shape=jax.ShapeDtypeStruct((P, 1, D), jnp.float32),
        grid_spec=pltpu.PrefetchScalarGridSpec(
            num_scalar_prefetch=1,
            grid=(P, num_tiles),                             # reduction axis last
            in_specs=[pl.BlockSpec((tn, D),
                                   lambda p, i, n: (p * num_tiles + i, 0))],
            out_specs=pl.BlockSpec((1, 1, D), lambda p, i, n: (p, 0, 0)),
            scratch_shapes=[pltpu.VMEM((8, D), jnp.float32)],
        ),
        compiler_params=pltpu.CompilerParams(
            # TODO(synk): on v7x, verify axis 0 actually shards across both
            # TensorCores; if not, switch it to pltpu.CORE_PARALLEL.
            dimension_semantics=("parallel", "arbitrary"),
            vmem_limit_bytes=int(vmem_limit_bytes),
        ),
        cost_estimate=cost,
    )(jnp.asarray([N], dtype=jnp.int32), H)

    # Combine the P per-core partials (tiny) and cast back to the input dtype.
    return jnp.sum(partials, axis=(0, 1)).astype(in_dtype)


if __name__ == "__main__":
    k1, k2, k3 = jax.random.split(jax.random.PRNGKey(0), 3)

    # --- small test matching the module (GraphPooling has no parameters) ----
    N, D = 8, 32
    H = jax.random.normal(k1, (N, D), dtype=jnp.float32)
    pooled = jax.block_until_ready(graph_pooling(H))
    ref = jnp.sum(H, axis=0)
    assert pooled.shape == ref.shape == (D,)
    assert jnp.allclose(pooled, ref, atol=1e-5, rtol=1e-5)

    # --- ragged N (not tile-aligned): exercises in-kernel masking of the
    #     overhanging last tile (no wrapper-side padding). -------------------
    N1, D1 = 123, 128
    H1 = jax.random.normal(k2, (N1, D1), dtype=jnp.float32)
    pooled1 = jax.block_until_ready(graph_pooling(H1, tile_bytes=32 * 1024))
    ref1 = jnp.sum(H1, axis=0)
    assert jnp.allclose(pooled1, ref1, atol=1e-4, rtol=1e-5)

    # --- bf16 input, multi-tile, explicit 2-way node split: exercises tiling,
    #     masking, the 'parallel' split and f32 accumulation. ----------------
    N2, D2 = 3000, 256
    H2 = jax.random.normal(k3, (N2, D2), dtype=jnp.float32).astype(jnp.bfloat16)
    pooled2 = jax.block_until_ready(
        graph_pooling(H2, num_splits=2, tile_bytes=64 * 1024)
    )
    ref2 = jnp.sum(H2.astype(jnp.float32), axis=0)
    assert pooled2.shape == (D2,) and pooled2.dtype == jnp.bfloat16
    assert jnp.allclose(pooled2.astype(jnp.float32), ref2, atol=0.5, rtol=2e-2)

    print("KERNEL_OK")
</pallas_src>

<mosaic_0001>
module attributes {stable_mosaic.version = 11 : i64} {
  func.func @_graph_pool_kernel(%arg0: i32, %arg1: i32, %arg2: memref<1xi32, #tpu.memory_space<smem>>, %arg3: memref<8x32xf32, #tpu.memory_space<vmem>>, %arg4: memref<1x1x32xf32, #tpu.memory_space<vmem>>, %arg5: memref<8x32xf32, #tpu.memory_space<vmem>>) attributes {dimension_semantics = [#tpu.dimension_semantics<parallel>, #tpu.dimension_semantics<arbitrary>], iteration_bounds = array<i64: 1, 1>, scalar_prefetch = 1 : i64, scratch_operands = 1 : i64, tpu.core_type = #tpu.core_type<tc>, window_params = [{transform_indices = @transform_0, window_bounds = array<i64: 8, 32>}, {transform_indices = @transform_1, window_bounds = array<i64: 1, 1, 32>}]} {
    %c0_i32 = arith.constant 0 : i32
    %0 = arith.cmpi eq, %arg1, %c0_i32 : i32
    %1 = arith.extui %0 : i1 to i32
    %c0_i32_0 = arith.constant 0 : i32
    %2 = arith.cmpi ne, %1, %c0_i32_0 : i32
    scf.if %2 {
      %cst = arith.constant 0.000000e+00 : f32
      %18 = vector.broadcast %cst : f32 to vector<8x32xf32>
      %c0_8 = arith.constant 0 : index
      %c0_9 = arith.constant 0 : index
      %19 = vector.load %arg5[%c0_8, %c0_9] : memref<8x32xf32, #tpu.memory_space<vmem>>, vector<8x32xf32>
      tpu.vector_store %arg5[%c0_8, %c0_9], %18 {strides = array<i32>} : memref<8x32xf32, #tpu.memory_space<vmem>>, vector<8x32xf32>,
    } else {
    }
    %c0 = arith.constant 0 : index
    %c0_1 = arith.constant 0 : index
    %3 = vector.load %arg3[%c0, %c0_1] : memref<8x32xf32, #tpu.memory_space<vmem>>, vector<8x32xf32>
    %c1_i32 = arith.constant 1 : i32
    %4 = arith.muli %arg0, %c1_i32 : i32
    %5 = arith.addi %4, %arg1 : i32
    %c0_2 = arith.constant 0 : index
    %6 = memref.load %arg2[%c0_2] : memref<1xi32, #tpu.memory_space<smem>>
    %c1_i32_3 = arith.constant 1 : i32
    %7 = arith.addi %5, %c1_i32_3 : i32
    %c8_i32 = arith.constant 8 : i32
    %8 = arith.muli %7, %c8_i32 : i32
    %9 = arith.cmpi sgt, %8, %6 : i32
    %true = arith.constant true
    %10 = arith.xori %9, %true : i1
    %11 = arith.extui %10 : i1 to i32
    %c0_i32_4 = arith.constant 0 : i32
    %12 = arith.cmpi ne, %11, %c0_i32_4 : i32
    scf.if %12 {
      %c0_8 = arith.constant 0 : index
      %c0_9 = arith.constant 0 : index
      %18 = vector.load %arg5[%c0_8, %c0_9] : memref<8x32xf32, #tpu.memory_space<vmem>>, vector<8x32xf32>
      %19 = vector.shape_cast %3 : vector<8x32xf32> to vector<1x8x32xf32>
      %cst = arith.constant dense<0.000000e+00> : vector<8x32xf32>
      %20 = vector.multi_reduction <add>, %19, %cst [0] : vector<1x8x32xf32> to vector<8x32xf32>
      %21 = arith.addf %18, %20 : vector<8x32xf32>
      %c0_10 = arith.constant 0 : index
      %c0_11 = arith.constant 0 : index
      %22 = vector.load %arg5[%c0_10, %c0_11] : memref<8x32xf32, #tpu.memory_space<vmem>>, vector<8x32xf32>
      tpu.vector_store %arg5[%c0_10, %c0_11], %21 {strides = array<i32>} : memref<8x32xf32, #tpu.memory_space<vmem>>, vector<8x32xf32>,
    } else {
    }
    %13 = arith.extui %9 : i1 to i32
    %c0_i32_5 = arith.constant 0 : i32
    %14 = arith.cmpi ne, %13, %c0_i32_5 : i32
    scf.if %14 {
      %18 = tpu.iota {dimensions = array<i32: 0>} : vector<8x32xi32>
      %c8_i32_8 = arith.constant 8 : i32
      %19 = arith.muli %5, %c8_i32_8 : i32
      %20 = vector.broadcast %19 : i32 to vector<8x32xi32>
      %21 = arith.addi %18, %20 : vector<8x32xi32>
      %22 = vector.broadcast %6 : i32 to vector<8x32xi32>
      %23 = arith.cmpi slt, %21, %22 : vector<8x32xi32>
      %cst = arith.constant 0.000000e+00 : f32
      %24 = vector.broadcast %cst : f32 to vector<8x32xf32>
      %25 = arith.select %23, %3, %24 : vector<8x32xi1>, vector<8x32xf32>
      %c0_9 = arith.constant 0 : index
      %c0_10 = arith.constant 0 : index
      %26 = vector.load %arg5[%c0_9, %c0_10] : memref<8x32xf32, #tpu.memory_space<vmem>>, vector<8x32xf32>
      %27 = vector.shape_cast %25 : vector<8x32xf32> to vector<1x8x32xf32>
      %cst_11 = arith.constant dense<0.000000e+00> : vector<8x32xf32>
      %28 = vector.multi_reduction <add>, %27, %cst_11 [0] : vector<1x8x32xf32> to vector<8x32xf32>
      %29 = arith.addf %26, %28 : vector<8x32xf32>
      %c0_12 = arith.constant 0 : index
      %c0_13 = arith.constant 0 : index
      %30 = vector.load %arg5[%c0_12, %c0_13] : memref<8x32xf32, #tpu.memory_space<vmem>>, vector<8x32xf32>
      tpu.vector_store %arg5[%c0_12, %c0_13], %29 {strides = array<i32>} : memref<8x32xf32, #tpu.memory_space<vmem>>, vector<8x32xf32>,
    } else {
    }
    %c0_i32_6 = arith.constant 0 : i32
    %15 = arith.cmpi eq, %arg1, %c0_i32_6 : i32
    %16 = arith.extui %15 : i1 to i32
    %c0_i32_7 = arith.constant 0 : i32
    %17 = arith.cmpi ne, %16, %c0_i32_7 : i32
    scf.if %17 {
      %c0_8 = arith.constant 0 : index
      %c0_9 = arith.constant 0 : index
      %18 = vector.load %arg5[%c0_8, %c0_9] : memref<8x32xf32, #tpu.memory_space<vmem>>, vector<8x32xf32>
      %cst = arith.constant dense<0.000000e+00> : vector<32xf32>
      %19 = vector.multi_reduction <add>, %18, %cst [0] : vector<8x32xf32> to vector<32xf32>
      %20 = vector.shape_cast %19 : vector<32xf32> to vector<1x32xf32>
      %c0_10 = arith.constant 0 : index
      %c0_11 = arith.constant 0 : index
      %c0_12 = arith.constant 0 : index
      %21 = vector.load %arg4[%c0_10, %c0_11, %c0_12] : memref<1x1x32xf32, #tpu.memory_space<vmem>>, vector<1x1x32xf32>
      %22 = vector.shape_cast %21 : vector<1x1x32xf32> to vector<1x32xf32>
      %23 = vector.shape_cast %20 : vector<1x32xf32> to vector<1x1x32xf32>
      tpu.vector_store %arg4[%c0_10, %c0_11, %c0_12], %23 {strides = array<i32>} : memref<1x1x32xf32, #tpu.memory_space<vmem>>, vector<1x1x32xf32>,
    } else {
    }
    return
  }
  func.func @transform_0(%arg0: i32, %arg1: i32, %arg2: memref<1xi32, #tpu.memory_space<smem>>) -> (i32, i32) {
    %c1_i32 = arith.constant 1 : i32
    %0 = arith.muli %arg0, %c1_i32 : i32
    %1 = arith.addi %0, %arg1 : i32
    %c0_i32 = arith.constant 0 : i32
    %c0_i32_0 = arith.constant 0 : i32
    return %1, %c0_i32 : i32, i32
  }
  func.func @transform_1(%arg0: i32, %arg1: i32, %arg2: memref<1xi32, #tpu.memory_space<smem>>) -> (i32, i32, i32) {
    %c0_i32 = arith.constant 0 : i32
    %c0_i32_0 = arith.constant 0 : i32
    %c0_i32_1 = arith.constant 0 : i32
    return %arg0, %c0_i32, %c0_i32_0 : i32, i32, i32
  }
}

</mosaic_0001>

<bundles_post_ra>
// kernel: tpu_custom_call.1
= control target key start
LH: loop header
LB: loop body
LE: loop exit
PB: predicated region body
PF: predicated region fallthrough
CT: control target
= control target key end

     0   :  { %8 = vsyncpa [#allocation6], 0  ;;  %s181_s0 = inlined_call_operand.<no memory space> [shape: s32[1], index: 0, kind: input, shape index: {}]   ;;  %s182_s1 = inlined_call_operand.hbm [shape: f32[8,32], index: 1, kind: input, shape index: {}]   ;;  %s183_s2 = inlined_call_operand.hbm [shape: f32[1,1,32], index: 2, kind: output, shape index: {}]  }
   0x1   :  { %9 = vsyncpa [#allocation7], 0  ;;  %s144_s9 = smov [#allocation5]  }
   0x2   :  { %s19_s10 = sshll.u32 %s144_s9, 4  ;;  %s20_s10 = int_to_ptr.vmem [resolvable:$true] %s19_s10 }
   0x3   :  { %s108_s11 = scalar_lea.vmem %s20_s10, 128  ;;  %p113_p1 = scmp.lt.s32.totalorder %s20_s10, %s20_s10 }
   0x4   :  { %p109_p0 = scmp.ne.s32.totalorder %s20_s10, %s108_s11  ;;  %p114_p2 = scmp.lt.s32.totalorder %s108_s11, %s108_s11 }
   0x6   :  { %p115_p3 = por %p114_p2, %p113_p1 }
   0x8   :  { %p116_p4 = pnand %p115_p3, %p109_p0 }
   0xa   :  { %119 = shalt.err (!%p116_p4)
}
   0xb   :  { %22 = dma.hbm_to_vmem [thread:$0]  %s182_s1, 128, %s20_s10, [#allocation6]  }
   0xc   :  { %140 = dma.done.wait [#allocation6], 128  }
   0xd   :  { %141 = vsyncadd [#allocation6], 4294967168  ;;  %vm31_vm0 = vcmask 261120   ;;  %v145_v0 = vmov 0.0   ;;  %v33_v1 = vld [vmem:[#allocation5] sm:$0xff]  ;;  %p95_p5 = scmp.lt.s32.totalorder %s181_s0, 8 }
   0xe   :  { %32 = vst.msk [vmem:[#allocation2] sm:$0xff] %vm31_vm0, %v145_v0 }
   0xf   :  { %42 = sbr.rel (%p95_p5) target bundleno = 25 (0x19), region = 17 }
  0x15   :  { %v43_v2 = vld [vmem:[#allocation2] sm:$0xff] }
  0x16   :  { %v45_v3 = vadd.f32 %v43_v2, %v33_v1 }
  0x18   :  { %47 = vst.msk [vmem:[#allocation2] sm:$0xff] %vm31_vm0, %v45_v3 }
  0x19 PF:  { %p96_p6 = scmp.ge.s32.totalorder %s181_s0, 8 }
  0x1b   :  { %50 = sbr.rel (%p96_p6) target bundleno = 41 (0x29), region = 21 }
  0x20   :  { %v51_v4 = vlaneseq  ;;  %v56_v5 = vstv %s181_s0  ;;  %v59_v7 = vld [vmem:[#allocation2] sm:$0xff] }
  0x22   :  { %v52_v6 = vshrl.u32 %v51_v4, 7 }
  0x24   :  { %vm57_vm1 = vcmp.lt.s32.totalorder %v52_v6, %v56_v5 }
  0x25   :  { %v58_v8 = vsel %vm57_vm1, %v33_v1, 0.0 }
  0x26   :  { %v61_v9 = vadd.f32 %v59_v7, %v58_v8 }
  0x28   :  { %63 = vst.msk [vmem:[#allocation2] sm:$0xff] %vm31_vm0, %v61_v9 }
  0x29 PF:  { %s146_s19 = smov [#allocation8]   ;;  %vm76_vm2 = vcmask 253952  }
  0x2a   :  { %s84_s20 = sshll.u32 %s146_s19, 4  ;;  %s85_s20 = int_to_ptr.vmem [resolvable:$true] %s84_s20 }
  0x2b   :  { %s120_s0 = scalar_lea.vmem %s85_s20, 16  ;;  %s124_s21 = scalar_lea.vmem %s85_s20, 32 }
  0x2c   :  { %p121_p7 = scmp.ne.s32.totalorder %s85_s20, %s120_s0  ;;  %p125_p8 = scmp.lt.s32.totalorder %s85_s20, %s85_s20 }
  0x2d   :  { %p126_p9 = scmp.lt.s32.totalorder %s124_s21, %s120_s0 }
  0x2f   :  { %v67_v10 = vld [vmem:[#allocation2] sm:$0xff]  ;;  %p127_p10 = por %p126_p9, %p125_p8 }
  0x30   :  { %v69_v11 = vsel %vm31_vm0, %v67_v10, 0.0 }
  0x31   :  { %v70_v12 = vrot.slane %v69_v11, 4  ;;  %p128_p11 = pnand %p127_p10, %p121_p7 }
  0x33   :  { %v71_v13 = vadd.f32 %v70_v12, %v69_v11 }
  0x35   :  { %v72_v14 = vrot.slane %v71_v13, 2 }
  0x37   :  { %v73_v15 = vadd.f32 %v72_v14, %v71_v13 }
  0x39   :  { %v74_v16 = vrot.slane %v73_v15, 1 }
  0x3b   :  { %v75_v17 = vadd.f32 %v74_v16, %v73_v15 }
  0x3d   :  { %77 = vst.msk [vmem:[#allocation8] sm:$0x1] %vm76_vm2, %v75_v17 }
  0x3e   :  { %131 = shalt.err (!%p128_p11)
}
  0x3f   :  { %87 = dma.vmem_to_hbm [thread:$0]  %s85_s20, 16, %s183_s2, [#allocation7]  }
  0x40   :  { %142 = dma.done.wait [#allocation7], 16  }
  0x41   :  { %143 = vsyncadd [#allocation7], 4294967280 }
  0x42   :  { %91 = vsyncpa [#allocation6], 1 }
  0x43   :  { %92 = vsyncpa [#allocation7], 1 }

</bundles_post_ra>
